<compile_context>
chip_gen: v6e
topology: v6e:2x2x1
jax: 0.10.0
libtpu: 0.0.40
codegen_flags: <defaults>
</compile_context>

<pallas_src>
import jax
import jax.numpy as jnp
from jax.experimental import pallas as pl
from jax.experimental.pallas import tpu as pltpu

_LANE = 128
_MIB = 1024 * 1024


def _lincomb_kernel(w_ref, x1_ref, x2_ref, x3_ref, o_ref):
    # w_ref: SMEM (3,) f32 scalar weights; x*_ref / o_ref: VMEM (tr, c) tiles.
    w1 = w_ref[0]
    w2 = w_ref[1]
    w3 = w_ref[2]
    acc = w1 * x1_ref[...] + w2 * x2_ref[...] + w3 * x3_ref[...]
    o_ref[...] = acc.astype(o_ref.dtype)


def _round_down(x, m):
    return (x // m) * m


def _vmem_capacity_bytes():
    """Best-effort VMEM query; conservative (v7x-sized) fallback."""
    try:
        info = pltpu.get_tpu_info()
        for attr in ("vmem_capacity_bytes", "vmem_bytes", "vmem_size_bytes"):
            v = getattr(info, attr, None)
            if isinstance(v, int) and v > 0:
                return v
    except Exception:
        pass
    return 64 * _MIB


def _device_tiling():
    vmem = _vmem_capacity_bytes()
    if vmem <= 64 * _MIB:
        # v7x: 64 MiB / TC.  4 operands x 2 buffers x 4 MiB = 32 MiB.
        return 4 * _MIB, 48 * _MIB
    # v5e / v6e: 128 MiB.  4 x 2 x 8 MiB = 64 MiB (<= 80 MiB scoped limit).
    return 8 * _MIB, 80 * _MIB


def _choose_2d_view(shape, n):
    """Zero-copy (r, c) view of the flattened input (c always divides n)."""
    if n % _LANE == 0:
        # Lane-dense path: c is a multiple of 128 dividing n; prefer r >= 8.
        if n >= 8 * _LANE:
            c_max = min(4096, max(_LANE, _round_down(n // 8, _LANE)))
        else:
            c_max = _LANE
        c = c_max
        while n % c != 0:
            c -= _LANE  # terminates: 128 divides n
        return n // c, c
    # Misaligned total size: keep a natural trailing-dim split (free reshape).
    c = 1
    for d in reversed(shape):
        c *= int(d)
        if c >= _LANE:
            break
    c = max(c, 1)
    return n // c, c


def _choose_row_tile(r, c, itemsize, max_tile_bytes):
    sub = {4: 8, 2: 16, 1: 32}.get(itemsize, 8)  # dtype-aware sublane multiple
    row_bytes = c * itemsize
    tr = max(1, max_tile_bytes // row_bytes)
    if tr >= r:
        # Whole array fits in one tile.  Split medium/large arrays into >= 2
        # row blocks so the "parallel" grid axis can shard across both v7x TCs.
        if r * row_bytes >= 2 * _MIB and r >= 2 * sub:
            return max(sub, _round_down(pl.cdiv(r, 2), sub))
        return r
    return max(sub, _round_down(tr, sub))


def linear_combination(weights, x1, x2, x3):
    """weights: (3,) scalars [w1, w2, w3]; x1/x2/x3: same-shape arrays."""
    assert x1.shape == x2.shape == x3.shape
    assert x1.dtype == x2.dtype == x3.dtype
    orig_shape = x1.shape
    dtype = x1.dtype
    itemsize = jnp.dtype(dtype).itemsize
    n = int(x1.size)

    # SMEM scalar reads want 32-bit; also protects against bf16 weights.
    weights = jnp.asarray(weights, dtype=jnp.float32).reshape(3)

    r, c = _choose_2d_view(orig_shape, n)
    max_tile_bytes, vmem_limit = _device_tiling()
    tr = _choose_row_tile(r, c, itemsize, max_tile_bytes)

    grid = (pl.cdiv(r, tr),)
    tile = pl.BlockSpec((tr, c), lambda i: (i, 0))

    cost = pl.CostEstimate(
        flops=5 * n,                       # 3 mul + 2 add per element
        transcendentals=0,
        bytes_accessed=4 * n * itemsize + 3 * 4,
    )

    out2d = pl.pallas_call(
        _lincomb_kernel,
        out_shape=jax.ShapeDtypeStruct((r, c), dtype),
        grid_spec=pl.GridSpec(
            grid=grid,
            in_specs=[
                pl.BlockSpec(memory_space=pltpu.SMEM),  # the 3 scalar weights
                tile,
                tile,
                tile,
            ],
            out_specs=tile,
        ),
        compiler_params=pltpu.CompilerParams(
            dimension_semantics=("parallel",),
            vmem_limit_bytes=vmem_limit,
        ),
        cost_estimate=cost,
    )(weights, x1.reshape(r, c), x2.reshape(r, c), x3.reshape(r, c))

    return out2d.reshape(orig_shape)


if __name__ == "__main__":
    key = jax.random.PRNGKey(0)
    k1, k2, k3 = jax.random.split(key, 3)

    # Parameters initialized as in the module's __init__ (all weights = 1.0).
    weights = jnp.array([1.0, 1.0, 1.0], dtype=jnp.float32)

    # Test 1: small batch of ensemble logits (16 examples x 256 logits).
    # Reshapes to an (8, 512) lane-dense, full-sublane single block.
    shape = (16, 256)
    x1 = jax.random.normal(k1, shape, dtype=jnp.float32)
    x2 = jax.random.normal(k2, shape, dtype=jnp.float32)
    x3 = jax.random.normal(k3, shape, dtype=jnp.float32)
    out = linear_combination(weights, x1, x2, x3)
    jax.block_until_ready(out)
    ref = weights[0] * x1 + weights[1] * x2 + weights[2] * x3
    assert out.shape == shape
    assert jnp.allclose(out, ref, atol=1e-5), "mismatch vs reference (test 1)"

    # Test 2: non-lane-aligned shape -> natural (37, 300) view, no pad/slice.
    shape2 = (37, 300)
    w_b = jnp.array([0.5, -1.25, 2.0], dtype=jnp.float32)
    y1 = jax.random.normal(k1, shape2, dtype=jnp.float32)
    y2 = jax.random.normal(k2, shape2, dtype=jnp.float32)
    y3 = jax.random.normal(k3, shape2, dtype=jnp.float32)
    out2 = linear_combination(w_b, y1, y2, y3)
    jax.block_until_ready(out2)
    ref2 = w_b[0] * y1 + w_b[1] * y2 + w_b[2] * y3
    assert jnp.allclose(out2, ref2, atol=1e-5), "mismatch vs reference (test 2)"

    # Test 3: larger input -> multi-tile path (grid >= 2 so both v7x TCs work).
    shape3 = (1024, 2048)
    z1 = jax.random.normal(k1, shape3, dtype=jnp.float32)
    z2 = jax.random.normal(k2, shape3, dtype=jnp.float32)
    z3 = jax.random.normal(k3, shape3, dtype=jnp.float32)
    out3 = linear_combination(weights, z1, z2, z3)
    jax.block_until_ready(out3)
    ref3 = weights[0] * z1 + weights[1] * z2 + weights[2] * z3
    assert jnp.allclose(out3, ref3, atol=1e-5), "mismatch vs reference (test 3)"

    print("KERNEL_OK")
</pallas_src>

<mosaic_0001>
module attributes {stable_mosaic.version = 11 : i64} {
  func.func @_lincomb_kernel(%arg0: i32, %arg1: memref<3xf32, #tpu.memory_space<smem>>, %arg2: memref<8x512xf32, #tpu.memory_space<vmem>>, %arg3: memref<8x512xf32, #tpu.memory_space<vmem>>, %arg4: memref<8x512xf32, #tpu.memory_space<vmem>>, %arg5: memref<8x512xf32, #tpu.memory_space<vmem>>) attributes {dimension_semantics = [#tpu.dimension_semantics<parallel>], iteration_bounds = array<i64: 1>, scalar_prefetch = 0 : i64, scratch_operands = 0 : i64, tpu.core_type = #tpu.core_type<tc>, window_params = [{transform_indices = @transform_0, window_bounds = array<i64: 3>}, {transform_indices = @transform_1, window_bounds = array<i64: 8, 512>}, {transform_indices = @transform_2, window_bounds = array<i64: 8, 512>}, {transform_indices = @transform_3, window_bounds = array<i64: 8, 512>}, {transform_indices = @transform_4, window_bounds = array<i64: 8, 512>}]} {
    %c0 = arith.constant 0 : index
    %0 = memref.load %arg1[%c0] : memref<3xf32, #tpu.memory_space<smem>>
    %c1 = arith.constant 1 : index
    %1 = memref.load %arg1[%c1] : memref<3xf32, #tpu.memory_space<smem>>
    %c2 = arith.constant 2 : index
    %2 = memref.load %arg1[%c2] : memref<3xf32, #tpu.memory_space<smem>>
    %c0_0 = arith.constant 0 : index
    %c0_1 = arith.constant 0 : index
    %3 = vector.load %arg2[%c0_0, %c0_1] : memref<8x512xf32, #tpu.memory_space<vmem>>, vector<8x512xf32>
    %4 = vector.broadcast %0 : f32 to vector<8x512xf32>
    %5 = arith.mulf %4, %3 : vector<8x512xf32>
    %c0_2 = arith.constant 0 : index
    %c0_3 = arith.constant 0 : index
    %6 = vector.load %arg3[%c0_2, %c0_3] : memref<8x512xf32, #tpu.memory_space<vmem>>, vector<8x512xf32>
    %7 = vector.broadcast %1 : f32 to vector<8x512xf32>
    %8 = arith.mulf %7, %6 : vector<8x512xf32>
    %9 = arith.addf %5, %8 : vector<8x512xf32>
    %c0_4 = arith.constant 0 : index
    %c0_5 = arith.constant 0 : index
    %10 = vector.load %arg4[%c0_4, %c0_5] : memref<8x512xf32, #tpu.memory_space<vmem>>, vector<8x512xf32>
    %11 = vector.broadcast %2 : f32 to vector<8x512xf32>
    %12 = arith.mulf %11, %10 : vector<8x512xf32>
    %13 = arith.addf %9, %12 : vector<8x512xf32>
    %c0_6 = arith.constant 0 : index
    %c0_7 = arith.constant 0 : index
    %14 = vector.load %arg5[%c0_6, %c0_7] : memref<8x512xf32, #tpu.memory_space<vmem>>, vector<8x512xf32>
    tpu.vector_store %arg5[%c0_6, %c0_7], %13 {strides = array<i32>} : memref<8x512xf32, #tpu.memory_space<vmem>>, vector<8x512xf32>,
    return
  }
  func.func @transform_0(%arg0: i32) -> i32 {
    %c0_i32 = arith.constant 0 : i32
    %c0_i32_0 = arith.constant 0 : i32
    return %c0_i32 : i32
  }
  func.func @transform_1(%arg0: i32) -> (i32, i32) {
    %c0_i32 = arith.constant 0 : i32
    %c0_i32_0 = arith.constant 0 : i32
    return %arg0, %c0_i32 : i32, i32
  }
  func.func @transform_2(%arg0: i32) -> (i32, i32) {
    %c0_i32 = arith.constant 0 : i32
    %c0_i32_0 = arith.constant 0 : i32
    return %arg0, %c0_i32 : i32, i32
  }
  func.func @transform_3(%arg0: i32) -> (i32, i32) {
    %c0_i32 = arith.constant 0 : i32
    %c0_i32_0 = arith.constant 0 : i32
    return %arg0, %c0_i32 : i32, i32
  }
  func.func @transform_4(%arg0: i32) -> (i32, i32) {
    %c0_i32 = arith.constant 0 : i32
    %c0_i32_0 = arith.constant 0 : i32
    return %arg0, %c0_i32 : i32, i32
  }
}

</mosaic_0001>

<bundles_post_ra>
// kernel: tpu_custom_call.1
= control target key start
LH: loop header
LB: loop body
LE: loop exit
PB: predicated region body
PF: predicated region fallthrough
CT: control target
= control target key end

     0   :  { %9 = vsyncpa [#allocation5], 0  ;;  %s271_s0 = inlined_call_operand.hbm [shape: f32[3], index: 0, kind: input, shape index: {}]   ;;  %s272_s1 = inlined_call_operand.hbm [shape: f32[8,512], index: 1, kind: input, shape index: {}]   ;;  %s273_s2 = inlined_call_operand.hbm [shape: f32[8,512], index: 2, kind: input, shape index: {}]   ;;  %s274_s3 = inlined_call_operand.hbm [shape: f32[8,512], index: 3, kind: input, shape index: {}]   ;;  %s275_s4 = inlined_call_operand.hbm [shape: f32[8,512], index: 4, kind: output, shape index: {}]  }
   0x1   :  { %10 = vsyncpa [#allocation3], 0 }
   0x2   :  { %11 = vsyncpa [#allocation8], 0 }
   0x3   :  { %12 = vsyncpa [#allocation4], 0  ;;  %s226_s15 = smov [#allocation7]   ;;  %s227_s17 = smov [#allocation6]  }
   0x4   :  { %s37_s16 = sshll.u32 %s226_s15, 4  ;;  %s27_s18 = sshll.u32 %s227_s17, 4  ;;  %s38_s16 = int_to_ptr.vmem [resolvable:$true] %s37_s16  ;;  %s28_s18 = int_to_ptr.vmem [resolvable:$true] %s27_s18 }
   0x5   :  { %s138_s19 = scalar_lea.vmem %s38_s16, 512  ;;  %p143_p1 = scmp.lt.s32.totalorder %s38_s16, %s38_s16 }
   0x6   :  { %p139_p0 = scmp.ne.s32.totalorder %s38_s16, %s138_s19  ;;  %p144_p2 = scmp.lt.s32.totalorder %s138_s19, %s138_s19 }
   0x8   :  { %p145_p3 = por %p144_p2, %p143_p1 }
   0xa   :  { %p146_p4 = pnand %p145_p3, %p139_p0 }
   0xc   :  { %149 = shalt.err (!%p146_p4)
}
   0xd   :  { %40 = dma.hbm_to_vmem [thread:$0]  %s273_s2, 512, %s38_s16, [#allocation8]  }
   0xe   :  { %s228_s22 = smov [#allocation2]   ;;  %s166_s25 = scalar_lea.vmem %s28_s18, 512 }
   0xf   :  { %20 = dma.hbm_to_smem %s271_s0, 16, %s228_s22, [#allocation5]  }
  0x10   :  { %p167_p5 = scmp.ne.s32.totalorder %s28_s18, %s166_s25  ;;  %p171_p6 = scmp.lt.s32.totalorder %s28_s18, %s28_s18 }
  0x11   :  { %p172_p7 = scmp.lt.s32.totalorder %s166_s25, %s166_s25 }
  0x13   :  { %p173_p8 = por %p172_p7, %p171_p6 }
  0x15   :  { %p174_p9 = pnand %p173_p8, %p167_p5 }
  0x17   :  { %177 = shalt.err (!%p174_p9)
}
  0x18   :  { %30 = dma.hbm_to_vmem [thread:$0]  %s272_s1, 512, %s28_s18, [#allocation3]  }
  0x19   :  { %s229_s28 = smov [#allocation9]  }
  0x1a   :  { %s47_s29 = sshll.u32 %s229_s28, 4  ;;  %s48_s29 = int_to_ptr.vmem [resolvable:$true] %s47_s29 }
  0x1b   :  { %s186_s2 = scalar_lea.vmem %s48_s29, 512  ;;  %p191_p11 = scmp.lt.s32.totalorder %s48_s29, %s48_s29 }
  0x1c   :  { %p187_p10 = scmp.ne.s32.totalorder %s48_s29, %s186_s2  ;;  %p192_p12 = scmp.lt.s32.totalorder %s186_s2, %s186_s2 }
  0x1e   :  { %p193_p13 = por %p192_p12, %p191_p11 }
  0x20   :  { %p194_p0 = pnand %p193_p13, %p187_p10 }
  0x22   :  { %197 = shalt.err (!%p194_p0)
}
  0x23   :  { %50 = dma.hbm_to_vmem [thread:$0]  %s274_s3, 512, %s48_s29, [#allocation8]  }
  0x24   :  { %218 = dma.done.wait [#allocation5], 16  }
  0x25   :  { %219 = vsyncadd [#allocation5], 4294967280 }
  0x26   :  { %220 = dma.done.wait [#allocation3], 512  }
  0x27   :  { %221 = vsyncadd [#allocation3], 4294966784 }
  0x28   :  { %222 = dma.done.wait [#allocation8], 1024  }
  0x29   :  { %223 = vsyncadd [#allocation8], 4294966272 }
  0x2a   :  { %63 = sfence }
  0x2b   :  { %s64_s1 = sld [smem:[#allocation2]]  ;;  %v67_v0 = vld [vmem:[#allocation6] sm:$0xff]  ;;  %v68_v2 = vld [vmem:[#allocation6 + $0x8] sm:$0xff]  ;;  %v69_v3 = vld [vmem:[#allocation6 + $0x10] sm:$0xff]  ;;  %s230_s3 = smov [#allocation10]  }
  0x2c   :  { %s123_s5 = sld [smem:[#allocation2 + $0x1]]  ;;  %v76_v1 = vld [vmem:[#allocation7] sm:$0xff]  ;;  %v77_v5 = vld [vmem:[#allocation7 + $0x8] sm:$0xff]  ;;  %v78_v6 = vld [vmem:[#allocation7 + $0x10] sm:$0xff]  ;;  %s112_s7 = sshll.u32 %s230_s3, 4  ;;  %s113_s7 = int_to_ptr.vmem [resolvable:$true] %s112_s7 }
  0x2d   :  { %s124_s6 = sld [smem:[#allocation2 + $0x2]]  ;;  %v89_v4 = vld [vmem:[#allocation9] sm:$0xff]  ;;  %v90_v8 = vld [vmem:[#allocation9 + $0x8] sm:$0xff]  ;;  %v91_v9 = vld [vmem:[#allocation9 + $0x10] sm:$0xff]  ;;  %s198_s8 = scalar_lea.vmem %s113_s7, 512 }
  0x2e   :  { %v70_v10 = vld [vmem:[#allocation6 + $0x18] sm:$0xff]  ;;  %p199_p1 = scmp.ne.s32.totalorder %s113_s7, %s198_s8  ;;  %p203_p2 = scmp.lt.s32.totalorder %s113_s7, %s113_s7 }
  0x2f   :  { %v79_v15 = vld [vmem:[#allocation7 + $0x18] sm:$0xff]  ;;  %p204_p3 = scmp.lt.s32.totalorder %s198_s8, %s198_s8 }
  0x30   :  { %v92_v20 = vld [vmem:[#allocation9 + $0x18] sm:$0xff] }
  0x31   :  { %v71_v7 = vstv %s64_s1  ;;  %p205_p4 = por %p204_p3, %p203_p2 }
  0x32   :  { %v72_v11 = vmul.f32 %v71_v7, %v67_v0  ;;  %v80_v12 = vstv %s123_s5  ;;  %v73_v13 = vmul.f32 %v71_v7, %v68_v2  ;;  %v74_v14 = vmul.f32 %v71_v7, %v69_v3 }
  0x33   :  { %v81_v16 = vmul.f32 %v80_v12, %v76_v1  ;;  %v93_v17 = vstv %s124_s6  ;;  %v82_v18 = vmul.f32 %v80_v12, %v77_v5  ;;  %v83_v19 = vmul.f32 %v80_v12, %v78_v6  ;;  %p206_p5 = pnand %p205_p4, %p199_p1 }
  0x34   :  { %v94_v21 = vmul.f32 %v93_v17, %v89_v4  ;;  %v95_v22 = vmul.f32 %v93_v17, %v90_v8  ;;  %v96_v23 = vmul.f32 %v93_v17, %v91_v9  ;;  %v75_v24 = vmul.f32 %v71_v7, %v70_v10 }
  0x35   :  { %v85_v25 = vadd.f32 %v81_v16, %v72_v11  ;;  %v86_v26 = vadd.f32 %v82_v18, %v73_v13  ;;  %v87_v27 = vadd.f32 %v83_v19, %v74_v14  ;;  %v84_v28 = vmul.f32 %v80_v12, %v79_v15 }
  0x36   :  { %v97_v29 = vmul.f32 %v93_v17, %v92_v20 }
  0x37   :  { %v98_v30 = vadd.f32 %v94_v21, %v85_v25  ;;  %v99_v31 = vadd.f32 %v95_v22, %v86_v26  ;;  %v100_v32 = vadd.f32 %v96_v23, %v87_v27  ;;  %v88_v33 = vadd.f32 %v84_v28, %v75_v24 }
  0x39   :  { %102 = vst [vmem:[#allocation10] sm:$0xff] %v98_v30  ;;  %103 = vst [vmem:[#allocation10 + $0x8] sm:$0xff] %v99_v31  ;;  %v101_v34 = vadd.f32 %v97_v29, %v88_v33 }
  0x3a   :  { %104 = vst [vmem:[#allocation10 + $0x10] sm:$0xff] %v100_v32 }
  0x3b   :  { %105 = vst [vmem:[#allocation10 + $0x18] sm:$0xff] %v101_v34 }
  0x3c   :  { %209 = shalt.err (!%p206_p5)
}
  0x3d   :  { %115 = dma.vmem_to_hbm [thread:$0]  %s113_s7, 512, %s275_s4, [#allocation4]  }
  0x3e   :  { %224 = dma.done.wait [#allocation4], 512  }
  0x3f   :  { %225 = vsyncadd [#allocation4], 4294966784 }
  0x40   :  { %119 = vsyncpa [#allocation3], 1 }
  0x41   :  { %120 = vsyncpa [#allocation8], 1 }
  0x42   :  { %121 = vsyncpa [#allocation4], 1 }
  0x43   :  { %122 = vsyncpa [#allocation5], 1 }

</bundles_post_ra>
